<compile_context>
chip_gen: v7x
topology: tpu7x:2x2x1
jax: 0.10.0
libtpu: 0.0.40
codegen_flags: <defaults>
</compile_context>

<pallas_src>
import math
from functools import partial

import jax
import jax.numpy as jnp
from jax.experimental import pallas as pl
from jax.experimental.pallas import tpu as pltpu


def _relu_kernel(x_ref, o_ref):
    # Elementwise ReLU on the whole VMEM tile (single VPU max per vreg).
    o_ref[...] = jnp.maximum(x_ref[...], jnp.zeros((), x_ref.dtype))


# Per-buffer budget (bytes) for the single-shot, no-grid path.
_SMALL_LIMIT_BYTES = 4 * 1024 * 1024
# Tiled fallback block: 512 rows x 512 lanes (f32 -> 1 MiB per block buffer).
_TILE_ROWS = 512
_TILE_LANES = 512


def _relu_small(flat: jax.Array) -> jax.Array:
    """Single pallas_call, no grid, full-array VMEM blocks (tiny tensors)."""
    total = flat.shape[0]
    # Lane-dense 2D view: 8 rows (full sublane) x as-wide-as-possible lanes.
    # This is a free, contiguous reshape (row-major).
    rows = 1
    for r in (8, 4, 2):
        if total % r == 0:
            rows = r
            break
    x2d = flat.reshape(rows, total // rows)

    out2d = pl.pallas_call(
        _relu_kernel,
        out_shape=jax.ShapeDtypeStruct(x2d.shape, x2d.dtype),
        in_specs=[pl.BlockSpec(memory_space=pltpu.MemorySpace.VMEM)],
        out_specs=pl.BlockSpec(memory_space=pltpu.MemorySpace.VMEM),
        input_output_aliases={0: 0},
    )(x2d)
    return out2d.reshape(-1)


def _relu_tiled(flat: jax.Array) -> jax.Array:
    """Tiled path for large activations: lane-dense blocks, parallel row grid."""
    total = flat.shape[0]
    block_elems = _TILE_ROWS * _TILE_LANES
    num_blocks = -(-total // block_elems)
    padded = num_blocks * block_elems
    flat_p = jnp.pad(flat, (0, padded - total)) if padded != total else flat

    x2d = flat_p.reshape(padded // _TILE_LANES, _TILE_LANES)
    out2d = pl.pallas_call(
        _relu_kernel,
        out_shape=jax.ShapeDtypeStruct(x2d.shape, x2d.dtype),
        grid=(num_blocks,),
        in_specs=[pl.BlockSpec((_TILE_ROWS, _TILE_LANES), lambda i: (i, 0))],
        out_specs=pl.BlockSpec((_TILE_ROWS, _TILE_LANES), lambda i: (i, 0)),
        input_output_aliases={0: 0},
        compiler_params=pltpu.CompilerParams(
            dimension_semantics=("parallel",)
        ),
    )(x2d)
    return out2d.reshape(-1)[:total]


@partial(jax.jit, static_argnames=("force_tiled",))
def relu_pallas(x: jax.Array, *, force_tiled: bool = False) -> jax.Array:
    """ReLU(x) with the hot path inside a Pallas TPU kernel (any shape)."""
    orig_shape = x.shape
    total = math.prod(orig_shape)
    flat = x.reshape(-1)

    nbytes = total * x.dtype.itemsize
    if force_tiled or nbytes > _SMALL_LIMIT_BYTES:
        out_flat = _relu_tiled(flat)
    else:
        out_flat = _relu_small(flat)
    return out_flat.reshape(orig_shape)


if __name__ == "__main__":
    # Deterministic example input matching the module's forward:
    # x221 ~ randn([1, 784, 7, 7])
    key = jax.random.PRNGKey(0)
    x221 = jax.random.normal(key, (1, 784, 7, 7), dtype=jnp.float32)

    out = relu_pallas(x221)
    jax.block_until_ready(out)

    ref = jnp.maximum(x221, 0.0)
    assert out.shape == x221.shape
    assert out.dtype == x221.dtype
    assert jnp.array_equal(out, ref)

    # Also sanity-check the tiled fallback path on a small input (forced).
    x_small = jax.random.normal(jax.random.PRNGKey(0), (2, 4, 16, 16),
                                dtype=jnp.float32)
    out_t = relu_pallas(x_small, force_tiled=True)
    jax.block_until_ready(out_t)
    assert jnp.array_equal(out_t, jnp.maximum(x_small, 0.0))

    print("KERNEL_OK")
</pallas_src>

<mosaic_0001>
module attributes {stable_mosaic.version = 11 : i64} {
  func.func @_relu_kernel(%arg0: memref<8x4802xf32, #tpu.memory_space<vmem>>, %arg1: memref<8x4802xf32, #tpu.memory_space<vmem>>) attributes {dimension_semantics = [], scalar_prefetch = 0 : i64, scratch_operands = 0 : i64, tpu.core_type = #tpu.core_type<tc>} {
    %c0 = arith.constant 0 : index
    %c0_0 = arith.constant 0 : index
    %0 = vector.load %arg0[%c0, %c0_0] : memref<8x4802xf32, #tpu.memory_space<vmem>>, vector<8x4802xf32>
    %cst = arith.constant 0.000000e+00 : f32
    %1 = vector.broadcast %cst : f32 to vector<8x4802xf32>
    %2 = arith.maximumf %0, %1 : vector<8x4802xf32>
    %c0_1 = arith.constant 0 : index
    %c0_2 = arith.constant 0 : index
    %3 = vector.load %arg1[%c0_1, %c0_2] : memref<8x4802xf32, #tpu.memory_space<vmem>>, vector<8x4802xf32>
    tpu.vector_store %arg1[%c0_1, %c0_2], %2 {strides = array<i32>} : memref<8x4802xf32, #tpu.memory_space<vmem>>, vector<8x4802xf32>,
    return
  }
}

</mosaic_0001>

<bundles_post_ra>
// kernel: relu_pallas.1
= control target key start
LH: loop header
LB: loop body
LE: loop exit
PB: predicated region body
PF: predicated region fallthrough
CT: control target
= control target key end

     0   :  { %vm121_vm0 = vcmask 539648   ;;  %s365_s0 = inlined_call_operand.vmem [shape: f32[8,4802], index: 0, kind: input, shape index: {}, may-alias: {0,1}]   ;;  %s366_s1 = inlined_call_operand.vmem [shape: f32[8,4802], index: 1, kind: output, shape index: {}, may-alias: {0,1}]  }
   0x1   :  { %v8_v0 = vld [vmem:[%s365_s0] sm:$0xff]  ;;  %v9_v1 = vld [vmem:[%s365_s0 + $0x8] sm:$0xff]  ;;  %v10_v2 = vld [vmem:[%s365_s0 + $0x10] sm:$0xff] }
   0x2   :  { %v46_v3 = vmax.f32 %v8_v0, 0.0  ;;  %v47_v4 = vmax.f32 %v9_v1, 0.0  ;;  %v48_v5 = vmax.f32 %v10_v2, 0.0  ;;  %v11_v6 = vld [vmem:[%s365_s0 + $0x18] sm:$0xff]  ;;  %v12_v7 = vld [vmem:[%s365_s0 + $0x20] sm:$0xff]  ;;  %v13_v8 = vld [vmem:[%s365_s0 + $0x28] sm:$0xff] }
   0x3   :  { %v49_v9 = vmax.f32 %v11_v6, 0.0  ;;  %v50_v10 = vmax.f32 %v12_v7, 0.0  ;;  %v51_v11 = vmax.f32 %v13_v8, 0.0  ;;  %v14_v12 = vld [vmem:[%s365_s0 + $0x30] sm:$0xff]  ;;  %v15_v13 = vld [vmem:[%s365_s0 + $0x38] sm:$0xff]  ;;  %v16_v14 = vld [vmem:[%s365_s0 + $0x40] sm:$0xff] }
   0x4   :  { %84 = vst [vmem:[%s366_s1] sm:$0xff] %v46_v3  ;;  %85 = vst [vmem:[%s366_s1 + $0x8] sm:$0xff] %v47_v4  ;;  %v52_v15 = vmax.f32 %v14_v12, 0.0  ;;  %v53_v16 = vmax.f32 %v15_v13, 0.0  ;;  %v54_v17 = vmax.f32 %v16_v14, 0.0 }
   0x5   :  { %86 = vst [vmem:[%s366_s1 + $0x10] sm:$0xff] %v48_v5 }
   0xc   :  { %v17_v18 = vld [vmem:[%s365_s0 + $0x48] sm:$0xff]  ;;  %v18_v19 = vld [vmem:[%s365_s0 + $0x50] sm:$0xff]  ;;  %v19_v20 = vld [vmem:[%s365_s0 + $0x58] sm:$0xff] }
   0xd   :  { %87 = vst [vmem:[%s366_s1 + $0x18] sm:$0xff] %v49_v9  ;;  %88 = vst [vmem:[%s366_s1 + $0x20] sm:$0xff] %v50_v10  ;;  %v55_v21 = vmax.f32 %v17_v18, 0.0  ;;  %v56_v22 = vmax.f32 %v18_v19, 0.0  ;;  %v57_v23 = vmax.f32 %v19_v20, 0.0 }
   0xe   :  { %89 = vst [vmem:[%s366_s1 + $0x28] sm:$0xff] %v51_v11 }
  0x15   :  { %v20_v24 = vld [vmem:[%s365_s0 + $0x60] sm:$0xff]  ;;  %v21_v25 = vld [vmem:[%s365_s0 + $0x68] sm:$0xff]  ;;  %v22_v26 = vld [vmem:[%s365_s0 + $0x70] sm:$0xff] }
  0x16   :  { %90 = vst [vmem:[%s366_s1 + $0x30] sm:$0xff] %v52_v15  ;;  %91 = vst [vmem:[%s366_s1 + $0x38] sm:$0xff] %v53_v16  ;;  %v58_v27 = vmax.f32 %v20_v24, 0.0  ;;  %v59_v28 = vmax.f32 %v21_v25, 0.0  ;;  %v60_v29 = vmax.f32 %v22_v26, 0.0 }
  0x17   :  { %92 = vst [vmem:[%s366_s1 + $0x40] sm:$0xff] %v54_v17 }
  0x1e   :  { %v23_v30 = vld [vmem:[%s365_s0 + $0x78] sm:$0xff]  ;;  %v24_v31 = vld [vmem:[%s365_s0 + $0x80] sm:$0xff]  ;;  %v25_v32 = vld [vmem:[%s365_s0 + $0x88] sm:$0xff] }
  0x1f   :  { %93 = vst [vmem:[%s366_s1 + $0x48] sm:$0xff] %v55_v21  ;;  %94 = vst [vmem:[%s366_s1 + $0x50] sm:$0xff] %v56_v22  ;;  %v61_v33 = vmax.f32 %v23_v30, 0.0  ;;  %v62_v34 = vmax.f32 %v24_v31, 0.0  ;;  %v63_v35 = vmax.f32 %v25_v32, 0.0 }
  0x20   :  { %95 = vst [vmem:[%s366_s1 + $0x58] sm:$0xff] %v57_v23 }
  0x27   :  { %v26_v36 = vld [vmem:[%s365_s0 + $0x90] sm:$0xff]  ;;  %v27_v37 = vld [vmem:[%s365_s0 + $0x98] sm:$0xff]  ;;  %v28_v38 = vld [vmem:[%s365_s0 + $0xa0] sm:$0xff] }
  0x28   :  { %96 = vst [vmem:[%s366_s1 + $0x60] sm:$0xff] %v58_v27  ;;  %97 = vst [vmem:[%s366_s1 + $0x68] sm:$0xff] %v59_v28  ;;  %v64_v39 = vmax.f32 %v26_v36, 0.0  ;;  %v65_v40 = vmax.f32 %v27_v37, 0.0  ;;  %v66_v41 = vmax.f32 %v28_v38, 0.0 }
  0x29   :  { %98 = vst [vmem:[%s366_s1 + $0x70] sm:$0xff] %v60_v29 }
  0x30   :  { %v29_v42 = vld [vmem:[%s365_s0 + $0xa8] sm:$0xff]  ;;  %v30_v43 = vld [vmem:[%s365_s0 + $0xb0] sm:$0xff]  ;;  %v31_v44 = vld [vmem:[%s365_s0 + $0xb8] sm:$0xff] }
  0x31   :  { %99 = vst [vmem:[%s366_s1 + $0x78] sm:$0xff] %v61_v33  ;;  %100 = vst [vmem:[%s366_s1 + $0x80] sm:$0xff] %v62_v34  ;;  %v67_v45 = vmax.f32 %v29_v42, 0.0  ;;  %v68_v46 = vmax.f32 %v30_v43, 0.0  ;;  %v69_v47 = vmax.f32 %v31_v44, 0.0 }
  0x32   :  { %101 = vst [vmem:[%s366_s1 + $0x88] sm:$0xff] %v63_v35 }
  0x39   :  { %v32_v48 = vld [vmem:[%s365_s0 + $0xc0] sm:$0xff]  ;;  %v33_v49 = vld [vmem:[%s365_s0 + $0xc8] sm:$0xff]  ;;  %v34_v50 = vld [vmem:[%s365_s0 + $0xd0] sm:$0xff] }
  0x3a   :  { %102 = vst [vmem:[%s366_s1 + $0x90] sm:$0xff] %v64_v39  ;;  %103 = vst [vmem:[%s366_s1 + $0x98] sm:$0xff] %v65_v40  ;;  %v70_v51 = vmax.f32 %v32_v48, 0.0  ;;  %v71_v52 = vmax.f32 %v33_v49, 0.0  ;;  %v72_v53 = vmax.f32 %v34_v50, 0.0 }
  0x3b   :  { %104 = vst [vmem:[%s366_s1 + $0xa0] sm:$0xff] %v66_v41 }
  0x42   :  { %v35_v54 = vld [vmem:[%s365_s0 + $0xd8] sm:$0xff]  ;;  %v36_v55 = vld [vmem:[%s365_s0 + $0xe0] sm:$0xff]  ;;  %v37_v56 = vld [vmem:[%s365_s0 + $0xe8] sm:$0xff] }
  0x43   :  { %105 = vst [vmem:[%s366_s1 + $0xa8] sm:$0xff] %v67_v45  ;;  %106 = vst [vmem:[%s366_s1 + $0xb0] sm:$0xff] %v68_v46  ;;  %v73_v57 = vmax.f32 %v35_v54, 0.0  ;;  %v74_v58 = vmax.f32 %v36_v55, 0.0  ;;  %v75_v59 = vmax.f32 %v37_v56, 0.0 }
  0x44   :  { %107 = vst [vmem:[%s366_s1 + $0xb8] sm:$0xff] %v69_v47 }
  0x4b   :  { %v38_v60 = vld [vmem:[%s365_s0 + $0xf0] sm:$0xff]  ;;  %v39_v61 = vld [vmem:[%s365_s0 + $0xf8] sm:$0xff]  ;;  %v40_v62 = vld [vmem:[%s365_s0 + $0x100] sm:$0xff] }
  0x4c   :  { %108 = vst [vmem:[%s366_s1 + $0xc0] sm:$0xff] %v70_v51  ;;  %109 = vst [vmem:[%s366_s1 + $0xc8] sm:$0xff] %v71_v52  ;;  %v76_v63 = vmax.f32 %v38_v60, 0.0  ;;  %v77_v0 = vmax.f32 %v39_v61, 0.0  ;;  %v78_v1 = vmax.f32 %v40_v62, 0.0 }
  0x4d   :  { %110 = vst [vmem:[%s366_s1 + $0xd0] sm:$0xff] %v72_v53 }
  0x54   :  { %v41_v2 = vld [vmem:[%s365_s0 + $0x108] sm:$0xff]  ;;  %v42_v3 = vld [vmem:[%s365_s0 + $0x110] sm:$0xff]  ;;  %v43_v4 = vld [vmem:[%s365_s0 + $0x118] sm:$0xff] }
  0x55   :  { %111 = vst [vmem:[%s366_s1 + $0xd8] sm:$0xff] %v73_v57  ;;  %112 = vst [vmem:[%s366_s1 + $0xe0] sm:$0xff] %v74_v58  ;;  %v79_v5 = vmax.f32 %v41_v2, 0.0  ;;  %v80_v6 = vmax.f32 %v42_v3, 0.0  ;;  %v81_v7 = vmax.f32 %v43_v4, 0.0 }
  0x56   :  { %113 = vst [vmem:[%s366_s1 + $0xe8] sm:$0xff] %v75_v59 }
  0x5d   :  { %v44_v8 = vld [vmem:[%s365_s0 + $0x120] sm:$0xff]  ;;  %v45_v9 = vld [vmem:[%s365_s0 + $0x128] sm:$0xff] }
  0x5e   :  { %114 = vst [vmem:[%s366_s1 + $0xf0] sm:$0xff] %v76_v63  ;;  %115 = vst [vmem:[%s366_s1 + $0xf8] sm:$0xff] %v77_v0  ;;  %v82_v10 = vmax.f32 %v44_v8, 0.0  ;;  %v83_v11 = vmax.f32 %v45_v9, 0.0 }
  0x5f   :  { %116 = vst [vmem:[%s366_s1 + $0x100] sm:$0xff] %v78_v1  ;;  %117 = vst [vmem:[%s366_s1 + $0x108] sm:$0xff] %v79_v5 }
  0x60   :  { %118 = vst [vmem:[%s366_s1 + $0x110] sm:$0xff] %v80_v6  ;;  %119 = vst [vmem:[%s366_s1 + $0x118] sm:$0xff] %v81_v7 }
  0x61   :  { %120 = vst [vmem:[%s366_s1 + $0x120] sm:$0xff] %v82_v10  ;;  %122 = vst.msk [vmem:[%s366_s1 + $0x128] sm:$0xff] %vm121_vm0, %v83_v11 }

</bundles_post_ra>
